<compile_context>
chip_gen: v7x
topology: tpu7x:2x2x1
jax: 0.10.0
libtpu: 0.0.40
codegen_flags: <defaults>
</compile_context>

<pallas_src>
import jax
import jax.numpy as jnp
from jax.experimental import pallas as pl
from jax.experimental.pallas import tpu as pltpu

_LANES = 128


def _swish_kernel(x_ref, o_ref):
    # Compute in f32: safe on all chips (v5e has no bf16 VPU/EUP); the op is
    # DMA-bound so the upcast is hidden.
    xf = x_ref[...].astype(jnp.float32)
    # Exact sigmoid: exp goes to the EUP, the add/div/mul ride the VPU; all of
    # it hides under the HBM<->VMEM DMA, so exactness costs nothing here.
    sig = 1.0 / (1.0 + jnp.exp(-xf))
    o_ref[...] = (xf * sig).astype(o_ref.dtype)


def swish(x: jax.Array, *, block_rows: int = 8192, donate: bool = False) -> jax.Array:
    """Elementwise swish: x * sigmoid(x). Works on any shape / dtype."""
    orig_shape = x.shape
    orig_dtype = x.dtype
    total = x.size
    if total == 0:
        return x

    # Flatten to a lane-dense (rows, 128) slab.
    rem = total % _LANES
    if rem == 0:
        padded_total = total
        x_flat = jnp.ravel(x)
    else:
        # TODO(synk): pad only a tiny tail chunk instead of the whole flat
        # tensor (full-tensor jnp.pad costs an extra HBM round trip); this
        # path is only hit when numel % 128 != 0, which typical UNet
        # activations never trigger.
        padded_total = total + (_LANES - rem)
        x_flat = jnp.pad(jnp.ravel(x), (0, _LANES - rem))
    rows = padded_total // _LANES
    x2d = x_flat.reshape(rows, _LANES)

    # Block size: 8192 rows x 128 lanes = 4 MiB per f32 block. One input +
    # one output, each double-buffered -> 16 MiB of VMEM, inside the default
    # scoped limit on every chip, so no vmem_limit_bytes override is needed.
    tile_rows = min(block_rows, rows)
    if tile_rows < rows:
        # Keep the (8, 128) block-tiling constraint when not spanning all rows.
        tile_rows = max(8, (tile_rows // 8) * 8)
    grid = (pl.cdiv(rows, tile_rows),)

    itemsize = jnp.dtype(orig_dtype).itemsize
    cost = pl.CostEstimate(
        flops=4 * total,
        transcendentals=total,
        bytes_accessed=2 * total * itemsize,
    )

    extra_kwargs = {}
    if donate:
        # Output aliases the input HBM buffer — avoids allocating a second
        # full-size activation buffer when the caller no longer needs x.
        extra_kwargs["input_output_aliases"] = {0: 0}

    out2d = pl.pallas_call(
        _swish_kernel,
        out_shape=jax.ShapeDtypeStruct((rows, _LANES), orig_dtype),
        grid_spec=pltpu.PrefetchScalarGridSpec(
            num_scalar_prefetch=0,
            grid=grid,
            in_specs=[pl.BlockSpec((tile_rows, _LANES), lambda i: (i, 0))],
            out_specs=pl.BlockSpec((tile_rows, _LANES), lambda i: (i, 0)),
        ),
        compiler_params=pltpu.CompilerParams(
            dimension_semantics=("parallel",),
        ),
        cost_estimate=cost,
        **extra_kwargs,
    )(x2d)

    out_flat = out2d.reshape(-1)
    if padded_total != total:
        out_flat = out_flat[:total]
    return out_flat.reshape(orig_shape)


if __name__ == "__main__":
    key = jax.random.PRNGKey(0)
    # NCHW, matching the PyTorch conv conventions used elsewhere in the model.
    x = jax.random.normal(key, (2, 4, 16, 16), dtype=jnp.float32)

    y = swish(x)
    jax.block_until_ready(y)

    # Reference check in plain JAX. The kernel uses exact sigmoid math, so a
    # tight tolerance holds (only a few f32 ULPs of formulation difference).
    y_ref = x * jax.nn.sigmoid(x)
    assert y.shape == x.shape and y.dtype == x.dtype
    assert jnp.allclose(y, y_ref, atol=1e-5, rtol=1e-5)

    print("KERNEL_OK")
</pallas_src>

<mosaic_0001>
module attributes {stable_mosaic.version = 11 : i64} {
  func.func @_swish_kernel(%arg0: i32, %arg1: memref<16x128xf32, #tpu.memory_space<vmem>>, %arg2: memref<16x128xf32, #tpu.memory_space<vmem>>) attributes {dimension_semantics = [#tpu.dimension_semantics<parallel>], iteration_bounds = array<i64: 1>, scalar_prefetch = 0 : i64, scratch_operands = 0 : i64, tpu.core_type = #tpu.core_type<tc>, window_params = [{transform_indices = @transform_0, window_bounds = array<i64: 16, 128>}, {transform_indices = @transform_1, window_bounds = array<i64: 16, 128>}]} {
    %c0 = arith.constant 0 : index
    %c0_0 = arith.constant 0 : index
    %0 = vector.load %arg1[%c0, %c0_0] : memref<16x128xf32, #tpu.memory_space<vmem>>, vector<16x128xf32>
    %cst = arith.constant 0.000000e+00 : f32
    %1 = vector.broadcast %cst : f32 to vector<16x128xf32>
    %2 = arith.subf %1, %0 : vector<16x128xf32>
    %3 = math.exp %2 : vector<16x128xf32>
    %cst_1 = arith.constant 1.000000e+00 : f32
    %4 = vector.broadcast %cst_1 : f32 to vector<16x128xf32>
    %5 = arith.addf %4, %3 : vector<16x128xf32>
    %cst_2 = arith.constant 1.000000e+00 : f32
    %6 = vector.broadcast %cst_2 : f32 to vector<16x128xf32>
    %7 = arith.divf %6, %5 : vector<16x128xf32>
    %8 = arith.mulf %0, %7 : vector<16x128xf32>
    %c0_3 = arith.constant 0 : index
    %c0_4 = arith.constant 0 : index
    %9 = vector.load %arg2[%c0_3, %c0_4] : memref<16x128xf32, #tpu.memory_space<vmem>>, vector<16x128xf32>
    tpu.vector_store %arg2[%c0_3, %c0_4], %8 {strides = array<i32>} : memref<16x128xf32, #tpu.memory_space<vmem>>, vector<16x128xf32>,
    return
  }
  func.func @transform_0(%arg0: i32) -> (i32, i32) {
    %c0_i32 = arith.constant 0 : i32
    %c0_i32_0 = arith.constant 0 : i32
    return %arg0, %c0_i32 : i32, i32
  }
  func.func @transform_1(%arg0: i32) -> (i32, i32) {
    %c0_i32 = arith.constant 0 : i32
    %c0_i32_0 = arith.constant 0 : i32
    return %arg0, %c0_i32 : i32, i32
  }
}

</mosaic_0001>

<bundles_post_ra>
// kernel: tpu_custom_call.1
= control target key start
LH: loop header
LB: loop body
LE: loop exit
PB: predicated region body
PF: predicated region fallthrough
CT: control target
= control target key end

     0   :  { %6 = vsyncpa [#allocation3], 0  ;;  %s162_s0 = inlined_call_operand.hbm [shape: f32[16,128], index: 0, kind: input, shape index: {}]   ;;  %s163_s1 = inlined_call_operand.hbm [shape: f32[16,128], index: 1, kind: output, shape index: {}]  }
   0x1   :  { %7 = vsyncpa [#allocation4], 0  ;;  %s118_s6 = smov [#allocation2]   ;;  %s70_s10 = scalar_lea.hbm %s162_s0, 256 }
   0x2   :  { %s13_s7 = sshll.u32 %s118_s6, 4  ;;  %p71_p0 = scmp.ne.s32.totalorder %s162_s0, %s70_s10  ;;  %s14_s7 = int_to_ptr.vmem [resolvable:$true] %s13_s7 }
   0x3   :  { %p74_p1 = scmp.lt.u32.totalorder %s70_s10, %s162_s0 }
   0x5   :  { %p76_p2 = pnand %p74_p1, %p71_p0 }
   0x7   :  { %79 = shalt.err (!%p76_p2)
}
   0x8   :  { %s80_s15 = scalar_lea.vmem %s14_s7, 256  ;;  %p85_p4 = scmp.lt.s32.totalorder %s14_s7, %s14_s7 }
   0x9   :  { %p81_p3 = scmp.ne.s32.totalorder %s14_s7, %s80_s15  ;;  %p86_p5 = scmp.lt.s32.totalorder %s80_s15, %s80_s15 }
   0xb   :  { %p87_p6 = por %p86_p5, %p85_p4 }
   0xd   :  { %p88_p7 = pnand %p87_p6, %p81_p3 }
   0xf   :  { %91 = shalt.err (!%p88_p7)
}
  0x10   :  { %s119_s16 = smov 128   ;;  %s120_s17 = smov 8  }
  0x11   :  { %19 = dma.hbm_to_vmem [thread:$0]  %s162_s0, 256, %s14_s7, [#allocation3], %s119_s16, %s119_s16, %s120_s17  }
  0x12   :  { %114 = dma.done.wait [#allocation3], 256  }
  0x13   :  { %115 = vsyncadd [#allocation3], 4294967040  ;;  %v23_v0 = vld [vmem:[#allocation2] sm:$0xff]  ;;  %v24_v1 = vld [vmem:[#allocation2 + $0x8] sm:$0xff]  ;;  %s121_s20 = smov [#allocation5]  }
  0x14   :  { %v25_v2 = vsub.f32 0.0, %v23_v0  ;;  %v26_v3 = vsub.f32 0.0, %v24_v1  ;;  %s46_s21 = sshll.u32 %s121_s20, 4  ;;  %s47_s21 = int_to_ptr.vmem [resolvable:$true] %s46_s21 }
  0x15   :  { %s92_s0 = scalar_lea.vmem %s47_s21, 256  ;;  %p97_p9 = scmp.lt.s32.totalorder %s47_s21, %s47_s21 }
  0x16   :  { %v27_v4 = vmul.f32 1.442695, %v25_v2  ;;  %v29_v5 = vmul.f32 1.442695, %v26_v3  ;;  %p93_p8 = scmp.ne.s32.totalorder %s47_s21, %s92_s0  ;;  %p98_p10 = scmp.lt.s32.totalorder %s92_s0, %s92_s0 }
  0x18   :  { %62 = vpow2.f32 %v27_v4  ;;  %p99_p11 = por %p98_p10, %p97_p9 }
  0x19   :  { %64 = vpow2.f32 %v29_v5 }
  0x1a   :  { %p100_p12 = pnand %p99_p11, %p93_p8 }
  0x22   :  { %v63_v6 = vpop.eup %62 }
  0x23   :  { %v65_v7 = vpop.eup %64  ;;  %v31_v8 = vadd.f32 1.0, %v63_v6 }
  0x24   :  { %v32_v9 = vadd.f32 1.0, %v65_v7 }
  0x25   :  { %66 = vrcp.f32 %v31_v8 }
  0x26   :  { %68 = vrcp.f32 %v32_v9 }
  0x2f   :  { %v67_v10 = vpop.eup %66 }
  0x30   :  { %v69_v11 = vpop.eup %68  ;;  %v37_v12 = vmul.f32 %v67_v10, %v23_v0 }
  0x31   :  { %v38_v13 = vmul.f32 %v69_v11, %v24_v1 }
  0x32   :  { %39 = vst [vmem:[#allocation5] sm:$0xff] %v37_v12 }
  0x33   :  { %40 = vst [vmem:[#allocation5 + $0x8] sm:$0xff] %v38_v13 }
  0x34   :  { %103 = shalt.err (!%p100_p12)
}
  0x35   :  { %s104_s24 = scalar_lea.hbm %s163_s1, 256 }
  0x36   :  { %p105_p13 = scmp.ne.s32.totalorder %s163_s1, %s104_s24  ;;  %p108_p0 = scmp.lt.u32.totalorder %s104_s24, %s163_s1 }
  0x38   :  { %p110_p1 = pnand %p108_p0, %p105_p13 }
  0x3a   :  { %113 = shalt.err (!%p110_p1)
}
  0x3b   :  { %52 = dma.vmem_to_hbm [thread:$0]  %s47_s21, 256, %s163_s1, [#allocation4], %s119_s16, %s119_s16, %s120_s17  }
  0x3c   :  { %116 = dma.done.wait [#allocation4], 256  }
  0x3d   :  { %117 = vsyncadd [#allocation4], 4294967040 }
  0x3e   :  { %56 = vsyncpa [#allocation3], 1 }
  0x3f   :  { %57 = vsyncpa [#allocation4], 1 }

</bundles_post_ra>
